<compile_context>
chip_gen: v7x
topology: tpu7x:2x2x1
jax: 0.10.0
libtpu: 0.0.40
codegen_flags: <defaults>
</compile_context>

<pallas_src>
import functools

import jax
import jax.numpy as jnp
import numpy as np
from jax.experimental import pallas as pl
from jax.experimental.pallas import tpu as pltpu


LANE = 128
SUBLANE = 8
DEF_TM = 512                        # node-row tile (sublane axis of A)
DEF_TK = 2048                       # source-node reduction tile (lane axis of A)
BN_ROW_CAP = 1024                   # row block for the elementwise BN/ReLU pass
X_RESIDENT_BYTES = 8 * 1024 * 1024  # keep x fully VMEM-resident below this size
VMEM_LIMIT = 48 * 1024 * 1024       # safe on v7x (64 MiB phys); can be raised on v5e/v6e


def _round_up(x, m):
    return ((x + m - 1) // m) * m


def _pad2(a, rows, cols):
    return jnp.pad(a, ((0, rows - a.shape[0]), (0, cols - a.shape[1])))


def _tiles(n):
    """Pick (tm, tk, n_pad): tk | n_pad, tm | n_pad, and >= 2 row tiles."""
    tk = min(DEF_TK, max(LANE, int(pl.next_power_of_2(n))))
    n_pad = _round_up(n, tk)
    tm = min(DEF_TM, tk, max(SUBLANE, n_pad // 2))
    return tm, tk, n_pad


def _divisor_block(total, cap, step=LANE):
    """Largest multiple of `step` that divides `total` and is <= cap."""
    best = min(total, step)
    b = step
    while b <= min(total, cap):
        if total % b == 0:
            best = b
        b += step
    return best


# -----------------------------------------------------------------------------
# Kernels
# -----------------------------------------------------------------------------
def gin_mlp_stats_kernel(a_ref, x_ref, w1_ref, b1_ref, w2_ref, b2_ref,
                         h2_ref, sum_ref, sq_ref, acc_ref,
                         *, n_real, tm, tk, x_resident):
    """Fused GINConv aggregation + 2-layer MLP + partial BatchNorm statistics.

    Grid: (node-row tiles [parallel], source-node reduction tiles [arbitrary]).
    acc_ref accumulates A_tile @ x_tile (f32) over the reduction axis; on the
    last reduction step the bf16 MLP runs and per-tile BN partials are emitted.
    """
    # program_id / num_programs hoisted OUT of pl.when bodies (lowering fix).
    i = pl.program_id(0)
    k = pl.program_id(1)
    nk = pl.num_programs(1)

    @pl.when(k == 0)
    def _init():
        acc_ref[...] = jnp.zeros_like(acc_ref)

    if x_resident:
        # x is a single VMEM-resident block; slice the reduction chunk locally.
        x_blk = x_ref[pl.ds(k * tk, tk), :]
    else:
        x_blk = x_ref[...]

    # bf16 x bf16 -> f32 on the MXU.  (1 + eps) * x is folded into A's diagonal.
    acc_ref[...] += jnp.dot(a_ref[...], x_blk, preferred_element_type=jnp.float32)

    @pl.when(k == nk - 1)
    def _finalize():
        agg = acc_ref[...].astype(jnp.bfloat16)
        h1 = jnp.dot(agg, w1_ref[...],
                     preferred_element_type=jnp.float32) + b1_ref[...]
        h1 = jnp.maximum(h1, 0.0).astype(jnp.bfloat16)
        h2 = jnp.dot(h1, w2_ref[...],
                     preferred_element_type=jnp.float32) + b2_ref[...]
        h2_ref[...] = h2.astype(jnp.bfloat16)

        # Partial BatchNorm statistics over the *real* rows of this tile only
        # (padded rows are masked out so the global stats stay exact).
        row = jax.lax.broadcasted_iota(jnp.int32, (tm, 1), 0) + i * tm
        mask = (row < n_real).astype(jnp.float32)
        hm = h2 * mask
        sum_ref[0] = jnp.sum(hm, axis=0, keepdims=True)        # (1, Hp)
        sq_ref[0] = jnp.sum(hm * hm, axis=0, keepdims=True)    # (1, Hp)


def bn_relu_kernel(h2_ref, scale_ref, shift_ref, y_ref):
    """Pass 2 of BatchNorm (intermediate layers): folded affine + ReLU, bf16 out."""
    y = h2_ref[...].astype(jnp.float32) * scale_ref[...] + shift_ref[...]
    y_ref[...] = jnp.maximum(y, 0.0).astype(y_ref.dtype)


def bn_pool_kernel(h2_ref, scale_ref, shift_ref, p_ref, y_ref, pool_ref):
    """Pass 2 of BatchNorm (last layer, no ReLU) fused with per-row-tile
    global_add_pool partials (P_tile @ y_tile)."""
    y = h2_ref[...].astype(jnp.float32) * scale_ref[...] + shift_ref[...]
    y_ref[...] = y
    pool_ref[0] = jnp.dot(p_ref[...], y, preferred_element_type=jnp.float32)


# -----------------------------------------------------------------------------
# Parameters
# -----------------------------------------------------------------------------
def init_gin_params(key, num_features, hidden_dims, num_classes):
    """Deterministic PyTorch-style (uniform +-1/sqrt(fan_in)) initialization."""
    params = {"layers": []}
    for i, out_dim in enumerate(hidden_dims):
        in_dim = num_features if i == 0 else hidden_dims[i - 1]
        key, k1, k2, k3, k4 = jax.random.split(key, 5)
        s1 = 1.0 / np.sqrt(in_dim)
        s2 = 1.0 / np.sqrt(out_dim)
        layer = {
            # stored pre-transposed as [in, out] for the kernels
            "w1": jax.random.uniform(k1, (in_dim, out_dim), jnp.float32, -s1, s1),
            "b1": jax.random.uniform(k2, (1, out_dim), jnp.float32, -s1, s1),
            "w2": jax.random.uniform(k3, (out_dim, out_dim), jnp.float32, -s2, s2),
            "b2": jax.random.uniform(k4, (1, out_dim), jnp.float32, -s2, s2),
            "gamma": jnp.ones((1, out_dim), jnp.float32),   # BatchNorm1d defaults
            "beta": jnp.zeros((1, out_dim), jnp.float32),
        }
        params["layers"].append(layer)
    key, k5, k6 = jax.random.split(key, 3)
    s = 1.0 / np.sqrt(hidden_dims[-1])
    params["lin_w"] = jax.random.uniform(k5, (hidden_dims[-1], num_classes),
                                         jnp.float32, -s, s)
    params["lin_b"] = jax.random.uniform(k6, (1, num_classes), jnp.float32, -s, s)
    return params


# -----------------------------------------------------------------------------
# Forward pass
# -----------------------------------------------------------------------------
def gin_forward(params, x, edge_index, batch, num_graphs,
                return_hidden=False, layer=3, gin_eps=0.0, bn_eps=1e-5):
    """Mirrors GIN.forward: [GINConv -> BatchNorm1d -> ReLU(except last)] x L
    -> global_add_pool -> Linear.  BatchNorm uses training-mode batch stats."""
    n, f = x.shape
    num_layers = len(params["layers"])

    # ---- tile sizes / padded geometry (host glue) ---------------------------
    tm, tk, n_pad = _tiles(n)
    n_rows = n_pad // tm
    n_kt = n_pad // tk
    tb = _divisor_block(n_pad, BN_ROW_CAP)
    n_rb = n_pad // tb
    f_pad = _round_up(f, LANE)
    g_pad = _round_up(num_graphs, SUBLANE)

    # ---- dense adjacency with (1 + eps) folded into the diagonal, bf16 ------
    # (edge multiplicities and 1+eps=1.0 are exact in bf16; eps != 0 would be
    # quantized -- if exactness matters, add (1+eps)*x in f32 at k==0 instead.)
    src = edge_index[0]
    dst = edge_index[1]
    diag = jnp.arange(n)
    adj = (jnp.zeros((n_pad, n_pad), jnp.bfloat16)
           .at[dst, src].add(1.0)
           .at[diag, diag].add(1.0 + gin_eps))

    # one-hot graph membership for global_add_pool (zero-padded columns)
    pool = (batch[None, :] == jnp.arange(num_graphs)[:, None]).astype(jnp.float32)
    pool = _pad2(pool, g_pad, n_pad)

    xp = _pad2(x, n_pad, f_pad).astype(jnp.bfloat16)

    red_params = pltpu.CompilerParams(
        dimension_semantics=("parallel", "arbitrary"),
        vmem_limit_bytes=VMEM_LIMIT)
    elem_params = pltpu.CompilerParams(
        dimension_semantics=("parallel",),
        vmem_limit_bytes=VMEM_LIMIT)

    hidden_reps = []
    pool_part = None
    h = xp
    in_pad = f_pad
    for li, lp in enumerate(params["layers"]):
        out_dim = lp["w1"].shape[1]
        h_pad = _round_up(out_dim, LANE)
        w1p = _pad2(lp["w1"], in_pad, h_pad).astype(jnp.bfloat16)
        b1p = _pad2(lp["b1"], 1, h_pad)
        w2p = _pad2(lp["w2"], h_pad, h_pad).astype(jnp.bfloat16)
        b2p = _pad2(lp["b2"], 1, h_pad)
        gammap = _pad2(lp["gamma"], 1, h_pad)
        betap = _pad2(lp["beta"], 1, h_pad)

        x_resident = n_pad * in_pad * 2 <= X_RESIDENT_BYTES
        if x_resident:
            x_spec = pl.BlockSpec((n_pad, in_pad), lambda i, k: (0, 0))
        else:
            # TODO(synk): large-N fallback re-streams x once per row tile.
            x_spec = pl.BlockSpec((tk, in_pad), lambda i, k: (k, 0))

        cost = pl.CostEstimate(
            flops=(2 * n_pad * n_pad * in_pad
                   + 2 * n_pad * in_pad * h_pad + 2 * n_pad * h_pad * h_pad),
            transcendentals=0,
            bytes_accessed=(2 * n_pad * n_pad + 2 * n_pad * in_pad
                            + 2 * n_pad * h_pad + 2 * (in_pad + h_pad) * h_pad))

        kern = functools.partial(gin_mlp_stats_kernel, n_real=n, tm=tm, tk=tk,
                                 x_resident=x_resident)
        h2, s_sum, s_sq = pl.pallas_call(
            kern,
            grid_spec=pltpu.PrefetchScalarGridSpec(
                num_scalar_prefetch=0,
                grid=(n_rows, n_kt),
                in_specs=[
                    pl.BlockSpec((tm, tk), lambda i, k: (i, k)),          # A tile
                    x_spec,                                               # x (resident/stream)
                    pl.BlockSpec((in_pad, h_pad), lambda i, k: (0, 0)),   # W1 (resident)
                    pl.BlockSpec((1, h_pad), lambda i, k: (0, 0)),        # b1
                    pl.BlockSpec((h_pad, h_pad), lambda i, k: (0, 0)),    # W2
                    pl.BlockSpec((1, h_pad), lambda i, k: (0, 0)),        # b2
                ],
                out_specs=[
                    pl.BlockSpec((tm, h_pad), lambda i, k: (i, 0)),       # pre-BN h2 (bf16)
                    pl.BlockSpec((1, 1, h_pad), lambda i, k: (i, 0, 0)),  # BN sum partial
                    pl.BlockSpec((1, 1, h_pad), lambda i, k: (i, 0, 0)),  # BN sum-sq partial
                ],
                scratch_shapes=[pltpu.VMEM((tm, in_pad), jnp.float32)],
            ),
            out_shape=[
                jax.ShapeDtypeStruct((n_pad, h_pad), jnp.bfloat16),
                jax.ShapeDtypeStruct((n_rows, 1, h_pad), jnp.float32),
                jax.ShapeDtypeStruct((n_rows, 1, h_pad), jnp.float32),
            ],
            compiler_params=red_params,
            cost_estimate=cost,
        )(adj, h, w1p, b1p, w2p, b2p)

        # ---- two-pass BatchNorm: tiny cross-tile reduction (host glue) ------
        mean = jnp.sum(s_sum[:, 0, :], axis=0) / n
        var = jnp.maximum(jnp.sum(s_sq[:, 0, :], axis=0) / n - mean * mean, 0.0)
        scale1 = gammap[0] * jax.lax.rsqrt(var + bn_eps)
        shift1 = betap[0] - mean * scale1
        scale = scale1[None, :]
        shift = shift1[None, :]

        is_last = li == num_layers - 1
        if not is_last:
            y = pl.pallas_call(
                bn_relu_kernel,
                grid_spec=pltpu.PrefetchScalarGridSpec(
                    num_scalar_prefetch=0,
                    grid=(n_rb,),
                    in_specs=[
                        pl.BlockSpec((tb, h_pad), lambda i: (i, 0)),
                        pl.BlockSpec((1, h_pad), lambda i: (0, 0)),
                        pl.BlockSpec((1, h_pad), lambda i: (0, 0)),
                    ],
                    out_specs=pl.BlockSpec((tb, h_pad), lambda i: (i, 0)),
                ),
                out_shape=jax.ShapeDtypeStruct((n_pad, h_pad), jnp.bfloat16),
                compiler_params=elem_params,
            )(h2, scale, shift)
        else:
            # Last layer: fuse global_add_pool into the BN pass (per-row-tile
            # partials from the y tile already in VMEM); drop the pool kernel.
            y, pool_part = pl.pallas_call(
                bn_pool_kernel,
                grid_spec=pltpu.PrefetchScalarGridSpec(
                    num_scalar_prefetch=0,
                    grid=(n_rb,),
                    in_specs=[
                        pl.BlockSpec((tb, h_pad), lambda i: (i, 0)),
                        pl.BlockSpec((1, h_pad), lambda i: (0, 0)),
                        pl.BlockSpec((1, h_pad), lambda i: (0, 0)),
                        pl.BlockSpec((g_pad, tb), lambda i: (0, i)),      # P tile
                    ],
                    out_specs=[
                        pl.BlockSpec((tb, h_pad), lambda i: (i, 0)),
                        pl.BlockSpec((1, g_pad, h_pad), lambda i: (i, 0, 0)),
                    ],
                ),
                out_shape=[
                    jax.ShapeDtypeStruct((n_pad, h_pad), jnp.float32),
                    jax.ShapeDtypeStruct((n_rb, g_pad, h_pad), jnp.float32),
                ],
                compiler_params=elem_params,
            )(h2, scale, shift, pool)

        hidden_reps.append((y, out_dim))
        h = y
        in_pad = h_pad

    # ---- tiny cross-tile pooling sum + final Linear (plain JAX) -------------
    last_dim = hidden_reps[-1][1]
    pooled = jnp.sum(pool_part, axis=0)[:num_graphs, :last_dim]
    logits = pooled @ params["lin_w"] + params["lin_b"]

    if return_hidden:
        if layer < 1 or layer > num_layers:
            raise ValueError(f"Layer must be between 1 and {num_layers}, got {layer}")
        y_sel, od = hidden_reps[layer - 1]
        hidden = y_sel[:n, :od].astype(jnp.float32)
        return hidden, logits
    return logits


# -----------------------------------------------------------------------------
# Pure-JAX reference (mirrors the kernel's bf16 policy for a tight check)
# -----------------------------------------------------------------------------
def gin_forward_ref(params, x, edge_index, batch, num_graphs,
                    gin_eps=0.0, bn_eps=1e-5):
    n = x.shape[0]
    diag = jnp.arange(n)
    adj = (jnp.zeros((n, n), jnp.float32)
           .at[edge_index[1], edge_index[0]].add(1.0)
           .at[diag, diag].add(1.0 + gin_eps)).astype(jnp.bfloat16)
    pool = (batch[None, :] == jnp.arange(num_graphs)[:, None]).astype(jnp.float32)

    num_layers = len(params["layers"])
    h = x.astype(jnp.bfloat16)
    hidden = []
    for i, lp in enumerate(params["layers"]):
        agg = jnp.dot(adj, h, preferred_element_type=jnp.float32).astype(jnp.bfloat16)
        h1 = jnp.dot(agg, lp["w1"].astype(jnp.bfloat16),
                     preferred_element_type=jnp.float32) + lp["b1"]
        h1 = jnp.maximum(h1, 0.0).astype(jnp.bfloat16)
        h2 = jnp.dot(h1, lp["w2"].astype(jnp.bfloat16),
                     preferred_element_type=jnp.float32) + lp["b2"]
        mean = jnp.mean(h2, axis=0)
        var = jnp.maximum(jnp.mean(h2 * h2, axis=0) - mean * mean, 0.0)
        scale = lp["gamma"][0] * jax.lax.rsqrt(var + bn_eps)
        shift = lp["beta"][0] - mean * scale
        y = h2.astype(jnp.bfloat16).astype(jnp.float32) * scale + shift
        if i < num_layers - 1:
            y = jnp.maximum(y, 0.0).astype(jnp.bfloat16)
            hidden.append(y.astype(jnp.float32))
            h = y
        else:
            hidden.append(y)
            h = y
    logits = pool @ h @ params["lin_w"] + params["lin_b"]
    return hidden, logits


# -----------------------------------------------------------------------------
if __name__ == "__main__":
    key = jax.random.PRNGKey(0)

    # Small synthetic graph batch: 2 graphs, 8 nodes each.
    num_nodes = 16
    num_features = 8
    hidden_dims = [32, 32]
    num_classes = 3
    num_graphs = 2
    num_edges = 24

    key, kx, ke1, ke2 = jax.random.split(key, 4)
    x = jax.random.normal(kx, (num_nodes, num_features), jnp.float32)
    # Random edges kept inside each graph (first 8 nodes -> graph 0, rest -> 1).
    src0 = jax.random.randint(ke1, (num_edges // 2,), 0, 8)
    dst0 = jax.random.randint(ke2, (num_edges // 2,), 0, 8)
    src = jnp.concatenate([src0, src0 + 8])
    dst = jnp.concatenate([dst0, dst0 + 8])
    edge_index = jnp.stack([src, dst]).astype(jnp.int32)            # [2, E]
    batch = jnp.repeat(jnp.arange(num_graphs, dtype=jnp.int32), 8)  # [N]

    params = init_gin_params(jax.random.PRNGKey(42), num_features,
                             hidden_dims, num_classes)

    hidden2, logits = gin_forward(params, x, edge_index, batch, num_graphs,
                                  return_hidden=True, layer=2)
    jax.block_until_ready(logits)
    jax.block_until_ready(hidden2)

    # Sanity check against a plain-JAX reference with the same bf16 policy
    # (tolerances sized for bf16 intermediates / differing f32 sum orders).
    ref_hidden, ref_logits = gin_forward_ref(params, x, edge_index, batch, num_graphs)
    np.testing.assert_allclose(np.asarray(logits), np.asarray(ref_logits),
                               rtol=2e-2, atol=2e-2)
    np.testing.assert_allclose(np.asarray(hidden2), np.asarray(ref_hidden[1]),
                               rtol=2e-2, atol=2e-2)

    assert logits.shape == (num_graphs, num_classes)
    assert hidden2.shape == (num_nodes, hidden_dims[-1])
    print("KERNEL_OK")
</pallas_src>

<mosaic_0001>
module attributes {stable_mosaic.version = 11 : i64} {
  func.func @gin_mlp_stats_kernel(%arg0: i32, %arg1: i32, %arg2: memref<64x128xbf16, #tpu.memory_space<vmem>>, %arg3: memref<128x128xbf16, #tpu.memory_space<vmem>>, %arg4: memref<128x128xbf16, #tpu.memory_space<vmem>>, %arg5: memref<1x128xf32, #tpu.memory_space<vmem>>, %arg6: memref<128x128xbf16, #tpu.memory_space<vmem>>, %arg7: memref<1x128xf32, #tpu.memory_space<vmem>>, %arg8: memref<64x128xbf16, #tpu.memory_space<vmem>>, %arg9: memref<1x1x128xf32, #tpu.memory_space<vmem>>, %arg10: memref<1x1x128xf32, #tpu.memory_space<vmem>>, %arg11: memref<64x128xf32, #tpu.memory_space<vmem>>) attributes {dimension_semantics = [#tpu.dimension_semantics<parallel>, #tpu.dimension_semantics<arbitrary>], iteration_bounds = array<i64: 2, 1>, scalar_prefetch = 0 : i64, scratch_operands = 1 : i64, tpu.core_type = #tpu.core_type<tc>, window_params = [{transform_indices = @transform_0, window_bounds = array<i64: 64, 128>}, {pipeline_mode = #tpu.pipeline_mode<synchronous>, transform_indices = @transform_1, window_bounds = array<i64: 128, 128>}, {pipeline_mode = #tpu.pipeline_mode<synchronous>, transform_indices = @transform_2, window_bounds = array<i64: 128, 128>}, {pipeline_mode = #tpu.pipeline_mode<synchronous>, transform_indices = @transform_3, window_bounds = array<i64: 1, 128>}, {pipeline_mode = #tpu.pipeline_mode<synchronous>, transform_indices = @transform_4, window_bounds = array<i64: 128, 128>}, {pipeline_mode = #tpu.pipeline_mode<synchronous>, transform_indices = @transform_5, window_bounds = array<i64: 1, 128>}, {transform_indices = @transform_6, window_bounds = array<i64: 64, 128>}, {transform_indices = @transform_7, window_bounds = array<i64: 1, 1, 128>}, {transform_indices = @transform_8, window_bounds = array<i64: 1, 1, 128>}]} {
    %c0_i32 = arith.constant 0 : i32
    %0 = arith.cmpi eq, %arg1, %c0_i32 : i32
    %1 = arith.extui %0 : i1 to i32
    %c0_i32_0 = arith.constant 0 : i32
    %2 = arith.cmpi ne, %1, %c0_i32_0 : i32
    scf.if %2 {
      %cst_9 = arith.constant 0.000000e+00 : f32
      %14 = vector.broadcast %cst_9 : f32 to vector<64x128xf32>
      %c0_10 = arith.constant 0 : index
      %c0_11 = arith.constant 0 : index
      %15 = vector.load %arg11[%c0_10, %c0_11] : memref<64x128xf32, #tpu.memory_space<vmem>>, vector<64x128xf32>
      tpu.vector_store %arg11[%c0_10, %c0_11], %14 {strides = array<i32>} : memref<64x128xf32, #tpu.memory_space<vmem>>, vector<64x128xf32>,
    } else {
    }
    %c128_i32 = arith.constant 128 : i32
    %3 = arith.muli %arg1, %c128_i32 : i32
    %4 = arith.index_cast %3 : i32 to index
    %c0 = arith.constant 0 : index
    %5 = vector.load %arg3[%4, %c0] : memref<128x128xbf16, #tpu.memory_space<vmem>>, vector<128x128xbf16>
    %c0_1 = arith.constant 0 : index
    %c0_2 = arith.constant 0 : index
    %6 = vector.load %arg11[%c0_1, %c0_2] : memref<64x128xf32, #tpu.memory_space<vmem>>, vector<64x128xf32>
    %c0_3 = arith.constant 0 : index
    %c0_4 = arith.constant 0 : index
    %7 = vector.load %arg2[%c0_3, %c0_4] : memref<64x128xbf16, #tpu.memory_space<vmem>>, vector<64x128xbf16>
    %cst = arith.constant dense<0.000000e+00> : vector<64x128xf32>
    %8 = tpu.matmul %7, %5, %cst {dimension_numbers = #tpu.dot_dimension_numbers<[1], [0], [0], [1], [0, 0, 1, 1], [], []>} : vector<64x128xbf16>, vector<128x128xbf16>, vector<64x128xf32> -> vector<64x128xf32>
    %9 = arith.addf %6, %8 : vector<64x128xf32>
    %c0_5 = arith.constant 0 : index
    %c0_6 = arith.constant 0 : index
    %10 = vector.load %arg11[%c0_5, %c0_6] : memref<64x128xf32, #tpu.memory_space<vmem>>, vector<64x128xf32>
    tpu.vector_store %arg11[%c0_5, %c0_6], %9 {strides = array<i32>} : memref<64x128xf32, #tpu.memory_space<vmem>>, vector<64x128xf32>,
    %c0_i32_7 = arith.constant 0 : i32
    %11 = arith.cmpi eq, %arg1, %c0_i32_7 : i32
    %12 = arith.extui %11 : i1 to i32
    %c0_i32_8 = arith.constant 0 : i32
    %13 = arith.cmpi ne, %12, %c0_i32_8 : i32
    scf.if %13 {
      %c0_9 = arith.constant 0 : index
      %c0_10 = arith.constant 0 : index
      %14 = vector.load %arg11[%c0_9, %c0_10] : memref<64x128xf32, #tpu.memory_space<vmem>>, vector<64x128xf32>
      %15 = arith.truncf %14 : vector<64x128xf32> to vector<64x128xbf16>
      %c0_11 = arith.constant 0 : index
      %c0_12 = arith.constant 0 : index
      %16 = vector.load %arg4[%c0_11, %c0_12] : memref<128x128xbf16, #tpu.memory_space<vmem>>, vector<128x128xbf16>
      %cst_13 = arith.constant dense<0.000000e+00> : vector<64x128xf32>
      %17 = tpu.matmul %15, %16, %cst_13 {dimension_numbers = #tpu.dot_dimension_numbers<[1], [0], [0], [1], [0, 0, 1, 1], [], []>} : vector<64x128xbf16>, vector<128x128xbf16>, vector<64x128xf32> -> vector<64x128xf32>
      %c0_14 = arith.constant 0 : index
      %c0_15 = arith.constant 0 : index
      %18 = vector.load %arg5[%c0_14, %c0_15] : memref<1x128xf32, #tpu.memory_space<vmem>>, vector<1x128xf32>
      %19 = vector.broadcast %18 : vector<1x128xf32> to vector<64x128xf32>
      %20 = arith.addf %17, %19 : vector<64x128xf32>
      %cst_16 = arith.constant 0.000000e+00 : f32
      %21 = vector.broadcast %cst_16 : f32 to vector<64x128xf32>
      %22 = arith.maximumf %20, %21 : vector<64x128xf32>
      %23 = arith.truncf %22 : vector<64x128xf32> to vector<64x128xbf16>
      %c0_17 = arith.constant 0 : index
      %c0_18 = arith.constant 0 : index
      %24 = vector.load %arg6[%c0_17, %c0_18] : memref<128x128xbf16, #tpu.memory_space<vmem>>, vector<128x128xbf16>
      %cst_19 = arith.constant dense<0.000000e+00> : vector<64x128xf32>
      %25 = tpu.matmul %23, %24, %cst_19 {dimension_numbers = #tpu.dot_dimension_numbers<[1], [0], [0], [1], [0, 0, 1, 1], [], []>} : vector<64x128xbf16>, vector<128x128xbf16>, vector<64x128xf32> -> vector<64x128xf32>
      %c0_20 = arith.constant 0 : index
      %c0_21 = arith.constant 0 : index
      %26 = vector.load %arg7[%c0_20, %c0_21] : memref<1x128xf32, #tpu.memory_space<vmem>>, vector<1x128xf32>
      %27 = vector.broadcast %26 : vector<1x128xf32> to vector<64x128xf32>
      %28 = arith.addf %25, %27 : vector<64x128xf32>
      %29 = arith.truncf %28 : vector<64x128xf32> to vector<64x128xbf16>
      %c0_22 = arith.constant 0 : index
      %c0_23 = arith.constant 0 : index
      %30 = vector.load %arg8[%c0_22, %c0_23] : memref<64x128xbf16, #tpu.memory_space<vmem>>, vector<64x128xbf16>
      tpu.vector_store %arg8[%c0_22, %c0_23], %29 {strides = array<i32>} : memref<64x128xbf16, #tpu.memory_space<vmem>>, vector<64x128xbf16>,
      %31 = tpu.iota {dimensions = array<i32: 0>} : vector<64x1xi32>
      %c64_i32 = arith.constant 64 : i32
      %32 = arith.muli %arg0, %c64_i32 : i32
      %33 = vector.broadcast %32 : i32 to vector<64x1xi32>
      %34 = arith.addi %31, %33 : vector<64x1xi32>
      %c16_i32 = arith.constant 16 : i32
      %35 = vector.broadcast %c16_i32 : i32 to vector<64x1xi32>
      %36 = arith.cmpi slt, %34, %35 : vector<64x1xi32>
      %37 = arith.extui %36 : vector<64x1xi1> to vector<64x1xi32>
      %38 = arith.sitofp %37 : vector<64x1xi32> to vector<64x1xf32>
      %39 = vector.broadcast %38 : vector<64x1xf32> to vector<64x128xf32>
      %40 = arith.mulf %28, %39 : vector<64x128xf32>
      %cst_24 = arith.constant dense<0.000000e+00> : vector<128xf32>
      %41 = vector.multi_reduction <add>, %40, %cst_24 [0] : vector<64x128xf32> to vector<128xf32>
      %42 = vector.shape_cast %41 : vector<128xf32> to vector<1x128xf32>
      %c0_25 = arith.constant 0 : index
      %c0_26 = arith.constant 0 : index
      %c0_27 = arith.constant 0 : index
      %43 = vector.load %arg9[%c0_25, %c0_26, %c0_27] : memref<1x1x128xf32, #tpu.memory_space<vmem>>, vector<1x1x128xf32>
      %44 = vector.shape_cast %43 : vector<1x1x128xf32> to vector<1x128xf32>
      %45 = vector.shape_cast %42 : vector<1x128xf32> to vector<1x1x128xf32>
      tpu.vector_store %arg9[%c0_25, %c0_26, %c0_27], %45 {strides = array<i32>} : memref<1x1x128xf32, #tpu.memory_space<vmem>>, vector<1x1x128xf32>,
      %46 = arith.mulf %40, %40 : vector<64x128xf32>
      %cst_28 = arith.constant dense<0.000000e+00> : vector<128xf32>
      %47 = vector.multi_reduction <add>, %46, %cst_28 [0] : vector<64x128xf32> to vector<128xf32>
      %48 = vector.shape_cast %47 : vector<128xf32> to vector<1x128xf32>
      %c0_29 = arith.constant 0 : index
      %c0_30 = arith.constant 0 : index
      %c0_31 = arith.constant 0 : index
      %49 = vector.load %arg10[%c0_29, %c0_30, %c0_31] : memref<1x1x128xf32, #tpu.memory_space<vmem>>, vector<1x1x128xf32>
      %50 = vector.shape_cast %49 : vector<1x1x128xf32> to vector<1x128xf32>
      %51 = vector.shape_cast %48 : vector<1x128xf32> to vector<1x1x128xf32>
      tpu.vector_store %arg10[%c0_29, %c0_30, %c0_31], %51 {strides = array<i32>} : memref<1x1x128xf32, #tpu.memory_space<vmem>>, vector<1x1x128xf32>,
    } else {
    }
    return
  }
  func.func @transform_0(%arg0: i32, %arg1: i32) -> (i32, i32) {
    %c0_i32 = arith.constant 0 : i32
    return %arg0, %arg1 : i32, i32
  }
  func.func @transform_1(%arg0: i32, %arg1: i32) -> (i32, i32) {
    %c0_i32 = arith.constant 0 : i32
    %c0_i32_0 = arith.constant 0 : i32
    %c0_i32_1 = arith.constant 0 : i32
    return %c0_i32, %c0_i32_0 : i32, i32
  }
  func.func @transform_2(%arg0: i32, %arg1: i32) -> (i32, i32) {
    %c0_i32 = arith.constant 0 : i32
    %c0_i32_0 = arith.constant 0 : i32
    %c0_i32_1 = arith.constant 0 : i32
    return %c0_i32, %c0_i32_0 : i32, i32
  }
  func.func @transform_3(%arg0: i32, %arg1: i32) -> (i32, i32) {
    %c0_i32 = arith.constant 0 : i32
    %c0_i32_0 = arith.constant 0 : i32
    %c0_i32_1 = arith.constant 0 : i32
    return %c0_i32, %c0_i32_0 : i32, i32
  }
  func.func @transform_4(%arg0: i32, %arg1: i32) -> (i32, i32) {
    %c0_i32 = arith.constant 0 : i32
    %c0_i32_0 = arith.constant 0 : i32
    %c0_i32_1 = arith.constant 0 : i32
    return %c0_i32, %c0_i32_0 : i32, i32
  }
  func.func @transform_5(%arg0: i32, %arg1: i32) -> (i32, i32) {
    %c0_i32 = arith.constant 0 : i32
    %c0_i32_0 = arith.constant 0 : i32
    %c0_i32_1 = arith.constant 0 : i32
    return %c0_i32, %c0_i32_0 : i32, i32
  }
  func.func @transform_6(%arg0: i32, %arg1: i32) -> (i32, i32) {
    %c0_i32 = arith.constant 0 : i32
    %c0_i32_0 = arith.constant 0 : i32
    return %arg0, %c0_i32 : i32, i32
  }
  func.func @transform_7(%arg0: i32, %arg1: i32) -> (i32, i32, i32) {
    %c0_i32 = arith.constant 0 : i32
    %c0_i32_0 = arith.constant 0 : i32
    %c0_i32_1 = arith.constant 0 : i32
    return %arg0, %c0_i32, %c0_i32_0 : i32, i32, i32
  }
  func.func @transform_8(%arg0: i32, %arg1: i32) -> (i32, i32, i32) {
    %c0_i32 = arith.constant 0 : i32
    %c0_i32_0 = arith.constant 0 : i32
    %c0_i32_1 = arith.constant 0 : i32
    return %arg0, %c0_i32, %c0_i32_0 : i32, i32, i32
  }
}

</mosaic_0001>

<bundles_post_ra>
// kernel: tpu_custom_call.1
= control target key start
LH: loop header
LB: loop body
LE: loop exit
PB: predicated region body
PF: predicated region fallthrough
CT: control target
= control target key end

     0   :  { %s2317_s0 = inlined_call_operand.hbm [shape: bf16[128,128], index: 0, kind: input, shape index: {}]   ;;  %s2318_s1 = inlined_call_operand.hbm [shape: bf16[128,128], index: 1, kind: input, shape index: {}]   ;;  %s2319_s2 = inlined_call_operand.hbm [shape: bf16[128,128], index: 2, kind: input, shape index: {}]   ;;  %s2320_s3 = inlined_call_operand.vmem [shape: f32[1,128], index: 3, kind: input, shape index: {}]   ;;  %s2321_s4 = inlined_call_operand.hbm [shape: bf16[128,128], index: 4, kind: input, shape index: {}]   ;;  %s2322_s5 = inlined_call_operand.vmem [shape: f32[1,128], index: 5, kind: input, shape index: {}]   ;;  %s2323_s6 = inlined_call_operand.hbm [shape: bf16[128,128], index: 6, kind: output, shape index: {0}]   ;;  %s2324_s7 = inlined_call_operand.hbm [shape: f32[2,1,128], index: 7, kind: output, shape index: {1}]   ;;  %s2325_s8 = inlined_call_operand.hbm [shape: f32[2,1,128], index: 8, kind: output, shape index: {2}]  }
   0x1   :  { %2335 = sst [smem:[#allocation22_spill]] %s2317_s0 }
   0x2   :  { %2336 = sst [smem:[#allocation23_spill]] %s2324_s7 }
   0x3   :  { %2337 = sst [smem:[#allocation24_spill]] %s2325_s8 }
   0x4   :  { %14 = vsyncpa [#allocation4], 0 }
   0x5   :  { %16 = vsyncpa [#allocation4 + $0x1], 0 }
   0x6   :  { %17 = vsyncpa [#allocation7], 0 }
   0x7   :  { %18 = vsyncpa [#allocation10], 0 }
   0x8   :  { %19 = vsyncpa [#allocation5], 0 }
   0x9   :  { %21 = vsyncpa [#allocation5 + $0x1], 0 }
   0xa   :  { %22 = vsyncpa [#allocation13], 0 }
   0xb   :  { %24 = vsyncpa [#allocation13 + $0x1], 0  ;;  %s1931_s27 = smov 0   ;;  %s1933_s28 = smov 0  }
   0xc   :  { %s1935_s29 = smov 0   ;;  %s1937_s30 = smov 0  }
   0xd   :  { %s1939_s9 = smov 0   ;;  %s1941_s10 = smov 0  }
   0xe LB: > { %2338 = sst [smem:[#allocation20_spill]] %s1852_s27  ;;  %s1962_s11 = sadd.s32 4294967295, %s1872_s10   ;;  %s1872_s10 = sphi %s1941_s10, %s30_s10   ;;  %s1868_s9 = sphi %s1939_s9, %s2368_s9   ;;  %s1864_s30 = sphi %s1937_s30, %s2367_s30   ;;  %s1860_s29 = sphi %s1935_s29, %s2366_s29   ;;  %s1856_s28 = sphi %s1933_s28, %s2365_s28   ;;  %s1852_s27 = sphi %s1931_s27, %s2364_s27  }
   0xf   : > { %s2326_s12 = sadd.s32 4294967294, %s1872_s10   ;;  %p64_p0 = scmp.ne.s32.totalorder %s1856_s28, %s1852_s27 }
  0x10   : > { %p2327_p1 = scmp.eq.s32.totalorder %s1962_s11, 0  ;;  %p199_p3 = scmp.eq.s32.totalorder %s2326_s12, 1 }
  0x11   : > { %p1247_p5 = scmp.ge.s32.totalorder %s1872_s10, 1  ;;  %p258_p7 = scmp.lt.s32.totalorder %s1872_s10, 3 }
  0x12   : > { %p1973_p4 = por %p2327_p1, %p64_p0  ;;  %p1978_p6 = por %p199_p3, %p64_p0 }
  0x13   : > { %p1983_p8 = pnand %p1247_p5, %p258_p7  ;;  %s1874_s16 = smov [#allocation6]  }
  0x14   : > { %s2339_s13 = scalar_select %p1973_p4, 1, 0 }
  0x15   : > { %s2340_s14 = scalar_select %p1978_p6, 1, 0 }
  0x16   : > { %s2342_s15 = scalar_select %p1983_p8, 1, 0 }
  0x17   : > { %2341 = sst [smem:[#allocation21_spill]] %s2340_s14  ;;  %s270_s17 = sshll.u32 %s1874_s16, 4  ;;  %s1987_s17 = int_to_ptr.vmem [resolvable:$true] %s270_s17 }
  0x18   : > { %p1492_p9 = pneg %p1983_p8  ;;  %s1875_s19 = smov [#allocation8]  }
  0x19   : > { %s283_s20 = sshll.u32 %s1875_s19, 4  ;;  %s1876_s21 = smov [#allocation9]   ;;  %s1998_s20 = int_to_ptr.vmem [resolvable:$true] %s283_s20 }
  0x1a   : > { %p1994_p11 = pnand %p1492_p9, %p2327_p1  ;;  %s2000_s22 = sshll.u32 %s1876_s21, 4  ;;  %s300_s22 = int_to_ptr.vmem [resolvable:$true] %s2000_s22 }
  0x1b   : > { %s1608_s25 = scalar_lea.hbm %s2318_s1, 1024 }
  0x1c   : > { %p1609_p12 = scmp.ne.s32.totalorder %s2318_s1, %s1608_s25  ;;  %p2010_p13 = pneg %p1994_p11 }
  0x1d   : > { %p1615_p5 = scmp.lt.u32.totalorder %s1608_s25, %s2318_s1 }
  0x1e   : > { %p1611_p0 = pnand %p2010_p13, %p1609_p12 }
  0x20   : > { %p1612_p3 = pneg %p1611_p0 }
  0x22   : > { %p1617_p7 = pnand %p1615_p5, %p1612_p3 }
  0x24   : > { %1620 = shalt.err (!%p1617_p7)
}
  0x25   : > { %s1621_s23 = scalar_lea.vmem %s1987_s17, 1024  ;;  %p1629_p2 = scmp.lt.s32.totalorder %s1987_s17, %s1987_s17 }
  0x26   : > { %p1622_p9 = scmp.ne.s32.totalorder %s1987_s17, %s1621_s23  ;;  %p1630_p6 = scmp.lt.s32.totalorder %s1621_s23, %s1621_s23 }
  0x28   : > { %p1624_p10 = pnand %p1622_p9, %p2010_p13  ;;  %p1631_p12 = por %p1630_p6, %p1629_p2 }
  0x2a   : > { %p1625_p1 = pneg %p1624_p10 }
  0x2c   : > { %p1632_p0 = pnand %p1631_p12, %p1625_p1 }
  0x2e   : > { %1635 = shalt.err (!%p1632_p0)
}
  0x2f   : > { %s1877_s24 = smov 64   ;;  %s1878_s25 = smov 4  }
  0x30   : > { %1495 = dma.hbm_to_vmem [thread:$0]  (!%p1994_p11), %s2318_s1, 1024, %s1987_s17, [#allocation7], %s1877_s24, %s1877_s24, %s1878_s25  }
  0x31   : > { %s1636_s23 = scalar_lea.hbm %s2319_s2, 1024 }
  0x32   : > { %p1637_p1 = scmp.ne.s32.totalorder %s2319_s2, %s1636_s23  ;;  %p1643_p10 = scmp.lt.u32.totalorder %s1636_s23, %s2319_s2 }
  0x34   : > { %p1639_p2 = pnand %p1637_p1, %p2010_p13 }
  0x36   : > { %p1640_p6 = pneg %p1639_p2 }
  0x38   : > { %p1645_p3 = pnand %p1643_p10, %p1640_p6 }
  0x3a   : > { %1648 = shalt.err (!%p1645_p3)
}
  0x3b   : > { %s1649_s17 = scalar_lea.vmem %s1998_s20, 1024  ;;  %p1657_p12 = scmp.lt.s32.totalorder %s1998_s20, %s1998_s20 }
  0x3c   : > { %p1650_p5 = scmp.ne.s32.totalorder %s1998_s20, %s1649_s17  ;;  %p1658_p0 = scmp.lt.s32.totalorder %s1649_s17, %s1649_s17 }
  0x3e   : > { %p1652_p7 = pnand %p1650_p5, %p2010_p13  ;;  %p1659_p1 = por %p1658_p0, %p1657_p12 }
  0x40   : > { %p1653_p9 = pneg %p1652_p7 }
  0x42   : > { %p1660_p2 = pnand %p1659_p1, %p1653_p9 }
  0x44   : > { %1663 = shalt.err (!%p1660_p2)
}
  0x45   : > { %1498 = dma.hbm_to_vmem [thread:$0]  (!%p1994_p11), %s2319_s2, 1024, %s1998_s20, [#allocation7], %s1877_s24, %s1877_s24, %s1878_s25  }
  0x46   : > { %s1664_s26 = scalar_lea.hbm %s2321_s4, 1024 }
  0x47   : > { %p1665_p6 = scmp.ne.s32.totalorder %s2321_s4, %s1664_s26  ;;  %p1671_p5 = scmp.lt.u32.totalorder %s1664_s26, %s2321_s4 }
  0x49   : > { %p1667_p10 = pnand %p1665_p6, %p2010_p13 }
  0x4b   : > { %p1668_p3 = pneg %p1667_p10 }
  0x4d   : > { %p1673_p7 = pnand %p1671_p5, %p1668_p3 }
  0x4f   : > { %1676 = shalt.err (!%p1673_p7)
}
  0x50   : > { %s1677_s17 = scalar_lea.vmem %s300_s22, 1024  ;;  %p1685_p1 = scmp.lt.s32.totalorder %s300_s22, %s300_s22 }
  0x51   : > { %p1678_p9 = scmp.ne.s32.totalorder %s300_s22, %s1677_s17  ;;  %p1686_p2 = scmp.lt.s32.totalorder %s1677_s17, %s1677_s17 }
  0x53   : > { %p1680_p12 = pnand %p1678_p9, %p2010_p13  ;;  %p1687_p4 = por %p1686_p2, %p1685_p1 }
  0x55   : > { %p1681_p0 = pneg %p1680_p12 }
  0x57   : > { %p1688_p8 = pnand %p1687_p4, %p1681_p0 }
  0x59   : > { %1691 = shalt.err (!%p1688_p8)
}
  0x5a   : > { %1501 = dma.hbm_to_vmem [thread:$0]  (!%p1994_p11), %s2321_s4, 1024, %s300_s22, [#allocation10], %s1877_s24, %s1877_s24, %s1878_s25  }
  0x5b   : > { %s51_s12 = sadd.s32 1, %s1860_s29  ;;  %s42_s18 = sadd.s32 1, %s1868_s9 }
  0x5c   : > { %p58_p4 = scmp.ne.s32.totalorder %s1860_s29, %s1856_s28  ;;  %p44_p8 = scmp.ge.s32.totalorder %s42_s18, 2 }
  0x5d   : > { %p59_p13 = scmp.eq.s32.totalorder %s1872_s10, 0  ;;  %p2345_p6 = scmp.eq.s32.totalorder %s1962_s11, 1 }
  0x5e   : > { %p1519_p3 = scmp.lt.s32.totalorder %s1872_s10, 2  ;;  %s2370_s18 = smov (%p44_p8, %s42_s18), 0 }
  0x5f   : > { %p2089_p10 = por %p2345_p6, %p58_p4  ;;  %p60_p5 = por %p59_p13, %p58_p4 }
  0x60   : > { %s316_s27 = sand.u32 1, %s1860_s29   ;;  %s46_s14 = ssub.s32 %s1868_s9, %s2370_s18 }
  0x61   : > { %p49_p7 = scmp.eq.s32.totalorder %s46_s14, 0  ;;  %s1252_s22 = sshll.u32 %s316_s27, 5 }
  0x62   : > { %s1315_s26 = sshll.u32 %s1868_s9, 9  ;;  %s2347_s0 = sld [smem:[#allocation22_spill]] }
  0x63   : > { %s2101_s16 = scalar_select %p49_p7, %s1860_s29, %s51_s12  }
  0x64   : > { %s320_s17 = scalar_lea.vmem [#allocation3], %s1252_s22  ;;  %p2112_p11 = pnand %p1519_p3, %p60_p5 }
  0x65   : > { %s328_s20 = sshll.u32 %s320_s17, 4  ;;  %s2116_s12 = scalar_lea.sflag [#allocation4], %s316_s27  ;;  %s2108_s20 = int_to_ptr.vmem [resolvable:$true] %s328_s20 }
  0x66   : > { %p1694_p12 = pneg %p2112_p11 }
  0x68   : > { %s2106_s23 = scalar_lea.hbm %s2347_s0, %s1315_s26  ;;  %s1697_s19 = scalar_lea.hbm %s2347_s0, 1024 }
  0x69   : > { %s1692_s14 = scalar_lea.hbm %s2106_s23, 512  ;;  %p1698_p2 = scmp.lt.u32.totalorder %s2106_s23, %s2347_s0 }
  0x6a   : > { %p1693_p9 = scmp.ne.s32.totalorder %s2106_s23, %s1692_s14  ;;  %p1699_p4 = scmp.lt.u32.totalorder %s1697_s19, %s1692_s14 }
  0x6b   : > { %p1701_p13 = scmp.lt.u32.totalorder %s1692_s14, %s2106_s23 }
  0x6c   : > { %p1695_p0 = pnand %p1694_p12, %p1693_p9  ;;  %p1700_p8 = por %p1699_p4, %p1698_p2 }
  0x6e   : > { %p1696_p1 = pneg %p1695_p0  ;;  %p1702_p6 = por %p1701_p13, %p1700_p8 }
  0x70   : > { %p1703_p3 = pnand %p1702_p6, %p1696_p1 }
  0x72   : > { %1706 = shalt.err (!%p1703_p3)
}
  0x73   : > { %s1707_s27 = scalar_lea.vmem %s2108_s20, 512  ;;  %s1879_s22 = smov [#allocation3]  }
  0x74   : > { %p1708_p5 = scmp.ne.s32.totalorder %s2108_s20, %s1707_s27  ;;  %s1712_s26 = sshll.u32 %s1879_s22, 4  ;;  %s1713_s26 = int_to_ptr.vmem [resolvable:$false] %s1712_s26 }
  0x75   : > { %s1714_s21 = scalar_lea.vmem %s1713_s26, 1024  ;;  %p1715_p0 = scmp.lt.s32.totalorder %s2108_s20, %s1713_s26 }
  0x76   : > { %p1710_p7 = pnand %p1708_p5, %p1694_p12  ;;  %p1716_p2 = scmp.lt.s32.totalorder %s1714_s21, %s1707_s27 }
  0x78   : > { %p1711_p9 = pneg %p1710_p7  ;;  %p1717_p4 = por %p1716_p2, %p1715_p0 }
  0x7a   : > { %p1718_p8 = pnand %p1717_p4, %p1711_p9 }
  0x7c   : > { %1721 = shalt.err (!%p1718_p8)
}
  0x7d   : > { %1505 = dma.hbm_to_vmem [thread:$0]  (!%p2112_p11), %s2106_s23, 512, %s2108_s20, %s2116_s12, %s1877_s24, %s1877_s24, %s1878_s25  }
  0x7e   : > { %p2349_p12 = scmp.ne.s32.totalorder %s2342_s15, 0 }
  0x7f   : > { %s2150_s14 = sand.u32 (!%p2349_p12), 1, %s1856_s28   ;;  %p2350_p1 = scmp.ne.s32.totalorder (!%p2349_p12), %s2339_s13, 0 }
  0x80   : > { %340 = sbr.rel (%p2349_p12) target bundleno = 909 (0x38d), region = 44  ;;  %s1256_s19 = sshll.u32 (!%p2349_p12), %s2150_s14, 5 }
  0x81   : > { %s343_s17 = scalar_lea.sflag (!%p2349_p12), [#allocation4], %s2150_s14  ;;  %s2156_s7 = scalar_lea.vmem (!%p2349_p12), [#allocation3], %s1256_s19 }
  0x87   : > { %1831 = dma.done.wait (%p2350_p1), %s343_s17, 512  }
  0x88   : > { %1833 = vsyncadd (%p2350_p1), %s343_s17, 4294966784  ;;  %p2351_p11 = scmp.eq.s32.totalorder %s1962_s11, 0 }
  0x8a   : > { %1835 = dma.done.wait (%p2351_p11), [#allocation7], 2048   ;;  %p2352_p13 = pmov %p2351_p11 }
  0x8b   : > { %p2353_p6 = pmov %p2351_p11 }
  0x8c   : > { %1837 = vsyncadd (%p2352_p13), [#allocation7], 4294965248 }
  0x8d   : > { %1839 = dma.done.wait (%p2353_p6), [#allocation10], 1024   ;;  %p2354_p3 = pmov %p2353_p6 }
  0x8e   : > { %v1580_v0 = vld [vmem:[#allocation6] sm:$0xff]   ;;  %v1581_v1 = vld [vmem:[#allocation6 + $0x8] sm:$0xff]   ;;  %v1582_v2 = vld [vmem:[#allocation6 + $0x10] sm:$0xff]   ;;  %s1299_s24 = sshll.u32 %s1864_s30, 6  ;;  %s2183_s20 = scalar_lea.vmem [#allocation11], %s1256_s19 }
  0x8f   : > { %1841 = vsyncadd (%p2354_p3), [#allocation10], 4294966272  ;;  %1384 = vmatprep.subr.bf16.mxu0 %v1580_v0  ;;  %v1583_v3 = vld [vmem:[#allocation6 + $0x18] sm:$0xff]   ;;  %v1588_v4 = vld [vmem:[%s2156_s7] sm:$0xff]   ;;  %s1052_s12 = sshll.u32 %s2183_s20, 4  ;;  %s1324_s27 = sshll.u32 %s1864_s30, 9  ;;  %s2190_s12 = int_to_ptr.vmem [resolvable:$true] %s1052_s12 }
  0x90   : > { %1385 = vmatpush3.bf16.msra.mxu0 %v1580_v0  ;;  %1400 = vmatprep.mubr.bf16.mxu0 %v1588_v4  ;;  %v1584_v5 = vld [vmem:[#allocation6 + $0x20] sm:$0xff]   ;;  %v1593_v7 = vld [vmem:[#allocation8 + $0x8] sm:$0xff]   ;;  %v1594_v9 = vld [vmem:[#allocation8 + $0x10] sm:$0xff]   ;;  %s2196_s21 = scalar_lea.hbm %s2323_s6, %s1324_s27  ;;  %s1031_s19 = scalar_lea.sflag [#allocation5], %s2150_s14 }
  0x91   : > { %1386 = vmatprep.subr.bf16.mxu0 %v1581_v1  ;;  %v1592_v6 = vld [vmem:[#allocation8] sm:$0xff]   ;;  %v1585_v8 = vld [vmem:[#allocation6 + $0x28] sm:$0xff]   ;;  %v1586_v10 = vld [vmem:[#allocation6 + $0x30] sm:$0xff]   ;;  %s1722_s17 = scalar_lea.vmem %s2190_s12, 512 }
  0x92   : > { %1408 = vmatprep.subr.bf16.mxu1 %v1592_v6  ;;  %v1595_v11 = vld [vmem:[#allocation8 + $0x18] sm:$0xff]   ;;  %v1596_v13 = vld [vmem:[#allocation8 + $0x20] sm:$0xff]   ;;  %v1597_v14 = vld [vmem:[#allocation8 + $0x28] sm:$0xff]   ;;  %p1723_p5 = scmp.ne.s32.totalorder %s2190_s12, %s1722_s17 }
  0x93   : > { %1409 = vmatpush3.bf16.msra.mxu1 %v1592_v6  ;;  %v1587_v12 = vld [vmem:[#allocation6 + $0x38] sm:$0xff]   ;;  %v1589_v15 = vld [vmem:[%s2156_s7 + $0x8] sm:$0xff]   ;;  %v1590_v16 = vld [vmem:[%s2156_s7 + $0x10] sm:$0xff]  }
  0x94   : > { %1387 = vmatpush3.bf16.msra.mxu0 %v1581_v1  ;;  %1410 = vmatprep.subr.bf16.mxu1 %v1593_v7  ;;  %v1598_v17 = vld [vmem:[#allocation8 + $0x30] sm:$0xff]   ;;  %v1591_v18 = vld [vmem:[%s2156_s7 + $0x18] sm:$0xff]   ;;  %v1600_v20 = vld [vmem:[#allocation9] sm:$0xff]   ;;  %p1724_p7 = pnand %p1723_p5, %p2089_p10  ;;  %s1881_s7 = smov [#allocation11]  }
  0x95   : > { %1388 = vmatprep.subr.bf16.mxu0 %v1582_v2  ;;  %v1599_v19 = vld [vmem:[#allocation8 + $0x38] sm:$0xff]   ;;  %v1601_v21 = vld [vmem:[#allocation9 + $0x8] sm:$0xff]   ;;  %v1602_v22 = vld [vmem:[#allocation9 + $0x10] sm:$0xff]   ;;  %s1726_s13 = sshll.u32 %s1881_s7, 4  ;;  %s1727_s13 = int_to_ptr.vmem [resolvable:$false] %s1726_s13 }
  0x96   : > { %v1603_v23 = vld [vmem:[#allocation9 + $0x18] sm:$0xff]   ;;  %v1604_v24 = vld [vmem:[#allocation9 + $0x20] sm:$0xff]   ;;  %v1605_v25 = vld [vmem:[#allocation9 + $0x28] sm:$0xff]   ;;  %p1725_p9 = pneg %p1724_p7  ;;  %s1728_s15 = scalar_lea.vmem %s1727_s13, 1024 }
  0x97   : > { %1411 = vmatpush3.bf16.msra.mxu1 %v1593_v7  ;;  %v1606_v38 = vld [vmem:[#allocation9 + $0x30] sm:$0xff]   ;;  %v1607_v39 = vld [vmem:[#allocation9 + $0x38] sm:$0xff]   ;;  %v1273_v40 = vld [vmem:[%s2320_s3] ss:$0 sm:$0xff]  ;;  %v953_v7 = vstv %s1299_s24  ;;  %p1729_p0 = scmp.lt.s32.totalorder %s2190_s12, %s1727_s13  ;;  %p1730_p2 = scmp.lt.s32.totalorder %s1728_s15, %s1722_s17 }
  0x98   : > { %1389 = vmatpush3.bf16.msra.mxu0 %v1582_v2  ;;  %1412 = vmatprep.subr.bf16.mxu1 %v1594_v9 }
  0x99   : > { %1390 = vmatprep.subr.bf16.mxu0 %v1583_v3  ;;  %p1731_p4 = por %p1730_p2, %p1729_p0 }
  0x9b   : > { %1413 = vmatpush3.bf16.msra.mxu1 %v1594_v9  ;;  %p1732_p8 = pnand %p1731_p4, %p1725_p9 }
  0x9c   : > { %1391 = vmatpush3.bf16.msra.mxu0 %v1583_v3  ;;  %1414 = vmatprep.subr.bf16.mxu1 %v1595_v11 }
  0x9d   : > { %1392 = vmatprep.subr.bf16.mxu0 %v1584_v5 }
  0x9f   : > { %1415 = vmatpush3.bf16.msra.mxu1 %v1595_v11 }
  0xa0   : > { %1393 = vmatpush3.bf16.msra.mxu0 %v1584_v5  ;;  %1416 = vmatprep.subr.bf16.mxu1 %v1596_v13  ;;  %v943_v5 = vlaneseq }
  0xa1   : > { %1394 = vmatprep.subr.bf16.mxu0 %v1585_v8 }
  0xa2   : > { %v944_v6 = vshrl.u32 %v943_v5, 7 }
  0xa3   : > { %1417 = vmatpush3.bf16.msra.mxu1 %v1596_v13 }
  0xa4   : > { %1395 = vmatpush3.bf16.msra.mxu0 %v1585_v8  ;;  %1418 = vmatprep.subr.bf16.mxu1 %v1597_v14  ;;  %v946_v8 = vadd.s32 16, %v944_v6  ;;  %v945_v9 = vadd.s32 8, %v944_v6  ;;  %v954_v11 = vadd.s32 %v953_v7, %v944_v6 }
  0xa5   : > { %1396 = vmatprep.subr.bf16.mxu0 %v1586_v10 }
  0xa6   : > { %v955_v13 = vadd.s32 %v953_v7, %v945_v9  ;;  %vm962_vm0 = vcmp.lt.s32.totalorder %v954_v11, 16 }
  0xa7   : > { %1419 = vmatpush3.bf16.msra.mxu1 %v1597_v14 }
  0xa8   : > { %1397 = vmatpush3.bf16.msra.mxu0 %v1586_v10  ;;  %1420 = vmatprep.subr.bf16.mxu1 %v1598_v17  ;;  %v947_v10 = vadd.s32 24, %v944_v6  ;;  %vm963_vm2 = vcmp.lt.s32.totalorder %v955_v13, 16 }
  0xa9   : > { %1398 = vmatprep.subr.bf16.mxu0 %v1587_v12 }
  0xaa   : > { %v957_v14 = vadd.s32 %v953_v7, %v947_v10 }
  0xab   : > { %1421 = vmatpush3.bf16.msra.mxu1 %v1598_v17  ;;  %v1282_v17 = vld [vmem:[%s2322_s5] ss:$0 sm:$0xff] }
  0xac   : > { %1399 = vmatpush3.bf16.msra.mxu0 %v1587_v12  ;;  %1422 = vmatprep.subr.bf16.mxu1 %v1599_v19  ;;  %v956_v12 = vadd.s32 %v953_v7, %v946_v8  ;;  %vm965_vm3 = vcmp.lt.s32.totalorder %v957_v14, 16 }
  0xad   : > { %1432 = vmatprep.subr.bf16.mxu0 %v1600_v20 }
  0xae   : > { %vm964_vm1 = vcmp.lt.s32.totalorder %v956_v12, 16 }
  0xaf   : > { %1401 = vmatmul.mubr.bf16.vlgmr.msra.gmra.mrb[0].mxu0 %v1589_v15  ;;  %1423 = vmatpush3.bf16.msra.mxu1 %v1599_v19  ;;  %v950_v15 = vadd.s32 48, %v944_v6  ;;  %v949_v19 = vadd.s32 40, %v944_v6 }
  0xb0   : > { %1404 = vmatprep.mubr.bf16.mxu0 %v1590_v16  ;;  %1456 = vmatprep.subr.bf16.mxu1 %v1600_v20  ;;  %v948_v16 = vadd.s32 32, %v944_v6 }
  0xb1   : > { %1433 = vmatpush3.bf16.msra.mxu0 %v1600_v20 }
  0xb2   : > { %1434 = vmatprep.subr.bf16.mxu0 %v1601_v21 }
  0xb5   : > { %1435 = vmatpush3.bf16.msra.mxu0 %v1601_v21 }
  0xb6   : > { %1436 = vmatprep.subr.bf16.mxu0 %v1602_v22 }
  0xb7   : > { %1405 = vmatmul.mubr.bf16.gmra.mrb[4].mxu0 %v1591_v18 }
  0xb9   : > { %1437 = vmatpush3.bf16.msra.mxu0 %v1602_v22 }
  0xba   : > { %1438 = vmatprep.subr.bf16.mxu0 %v1603_v23 }
  0xbd   : > { %1439 = vmatpush3.bf16.msra.mxu0 %v1603_v23 }
  0xbe   : > { %1440 = vmatprep.subr.bf16.mxu0 %v1604_v24 }
  0xc1   : > { %1441 = vmatpush3.bf16.msra.mxu0 %v1604_v24 }
  0xc2   : > { %1442 = vmatprep.subr.bf16.mxu0 %v1605_v25 }
  0xc5   : > { %1443 = vmatpush3.bf16.msra.mxu0 %v1605_v25 }
  0xc6   : > { %1444 = vmatprep.subr.bf16.mxu0 %v1606_v38 }
  0xc9   : > { %1445 = vmatpush3.bf16.msra.mxu0 %v1606_v38 }
  0xca   : > { %1446 = vmatprep.subr.bf16.mxu0 %v1607_v39 }
  0xcd   : > { %1447 = vmatpush3.bf16.msra.mxu0 %v1607_v39 }
 0x182   : > { %v1402_v26 = vpop.f32.mrb[0].mxu0 }
 0x183   : > { %v557_v27 = vpop.f32.mrb[1].mxu0 }
 0x184   : > { %v1403_v28 = vpop.f32.mrb[2].mxu0 }
 0x185   : > { %v616_v29 = vpack.c.bf16 %v1403_v28, %v1402_v26  ;;  %v560_v30 = vpop.f32.mrb[3].mxu0  ;;  %v958_v28 = vadd.s32 %v953_v7, %v948_v16 }
 0x186   : > { %v615_v31 = vpack.c.bf16 %v560_v30, %v557_v27 }
 0x187   : > { %vm966_vm5 = vcmp.lt.s32.totalorder %v958_v28, 16 }
 0x188   : > { %1424 = vmatprep.mubr.bf16.mxu1 %v615_v31 }
 0x189   : > { %1425 = vmatmul.mubr.bf16.vlgmr.msra.gmra.mrb[0].mxu1 %v616_v29 }
 0x18a   : > { %v1406_v32 = vpop.f32.mrb[4].mxu0  ;;  %1464 = vmatpush3.bf16.msra.mxu1 %v1600_v20 }
 0x18b   : > { %v573_v33 = vpop.f32.mrb[5].mxu0  ;;  %1457 = vmatprep.subr.bf16.mxu1 %v1601_v21 }
 0x18c   : > { %v1407_v34 = vpop.f32.mrb[6].mxu0 }
 0x18d   : > { %v618_v35 = vpack.c.bf16 %v1407_v34, %v1406_v32  ;;  %v576_v36 = vpop.f32.mrb[7].mxu0 }
 0x18e   : > { %v617_v37 = vpack.c.bf16 %v576_v36, %v573_v33  ;;  %1465 = vmatpush3.bf16.msra.mxu1 %v1601_v21  ;;  %v1880_v21 = vmov 0.0   ;;  %v959_v36 = vadd.s32 %v953_v7, %v949_v19 }
 0x18f   : > { %1458 = vmatprep.subr.bf16.mxu1 %v1602_v22  ;;  %v1302_v29 = vsel %vm964_vm1, 1.0, %v1880_v21  ;;  %v1301_v32 = vsel %vm963_vm2, 1.0, %v1880_v21  ;;  %v1303_v34 = vsel %vm965_vm3, 1.0, %v1880_v21 }
 0x190   : > { %1428 = vmatprep.mubr.bf16.mxu1 %v617_v37  ;;  %vm967_vm6 = vcmp.lt.s32.totalorder %v959_v36, 16 }
 0x191   : > { %1429 = vmatmul.mubr.bf16.gmra.mrb[4].mxu1 %v618_v35 }
 0x192   : > { %1466 = vmatpush3.bf16.msra.mxu1 %v1602_v22  ;;  %v1300_v22 = vsel %vm962_vm0, 1.0, %v1880_v21 }
 0x193   : > { %1459 = vmatprep.subr.bf16.mxu1 %v1603_v23 }
 0x196   : > { %1467 = vmatpush3.bf16.msra.mxu1 %v1603_v23  ;;  %v960_v23 = vadd.s32 %v953_v7, %v950_v15 }
 0x197   : > { %1460 = vmatprep.subr.bf16.mxu1 %v1604_v24 }
 0x198   : > { %vm968_vm4 = vcmp.lt.s32.totalorder %v960_v23, 16 }
 0x19a   : > { %1468 = vmatpush3.bf16.msra.mxu1 %v1604_v24  ;;  %v951_v24 = vadd.s32 56, %v944_v6 }
 0x19b   : > { %1461 = vmatprep.subr.bf16.mxu1 %v1605_v25 }
 0x19e   : > { %1469 = vmatpush3.bf16.msra.mxu1 %v1605_v25 }
 0x19f   : > { %1462 = vmatprep.subr.bf16.mxu1 %v1606_v38 }
 0x1a2   : > { %1470 = vmatpush3.bf16.msra.mxu1 %v1606_v38  ;;  %v961_v38 = vadd.s32 %v953_v7, %v951_v24 }
 0x1a3   : > { %1463 = vmatprep.subr.bf16.mxu1 %v1607_v39 }
 0x1a4   : > { %vm969_vm7 = vcmp.lt.s32.totalorder %v961_v38, 16 }
 0x1a6   : > { %1471 = vmatpush3.bf16.msra.mxu1 %v1607_v39 }
 0x25c   : > { %v1426_v41 = vpop.f32.mrb[0].mxu1 }
 0x25d   : > { %v733_v42 = vadd.f32 %v1426_v41, %v1273_v40  ;;  %v724_v43 = vpop.f32.mrb[1].mxu1 }
 0x25e   : > { %v725_v44 = vadd.f32 %v1273_v40, %v724_v43  ;;  %v1427_v45 = vpop.f32.mrb[2].mxu1 }
 0x25f   : > { %v736_v46 = vadd.f32 %v1427_v45, %v1273_v40  ;;  %v727_v47 = vpop.f32.mrb[3].mxu1  ;;  %v757_v49 = vmax.f32 %v733_v42, 0.0 }
 0x260   : > { %v728_v48 = vadd.f32 %v1273_v40, %v727_v47  ;;  %v755_v51 = vmax.f32 %v725_v44, 0.0  ;;  %v1306_v47 = vsel %vm968_vm4, 1.0, %v1880_v21 }
 0x261   : > { %v758_v50 = vmax.f32 %v736_v46, 0.0 }
 0x262   : > { %v756_v52 = vmax.f32 %v728_v48, 0.0 }
 0x263   : > { %v764_v53 = vpack.c.bf16 %v758_v50, %v757_v49  ;;  %v1304_v49 = vsel %vm966_vm5, 1.0, %v1880_v21 }
 0x264   : > { %v763_v54 = vpack.c.bf16 %v756_v52, %v755_v51  ;;  %v1430_v55 = vpop.f32.mrb[4].mxu1 }
 0x265   : > { %v749_v56 = vadd.f32 %v1430_v55, %v1273_v40  ;;  %v740_v57 = vpop.f32.mrb[5].mxu1 }
 0x266   : > { %v741_v58 = vadd.f32 %v1273_v40, %v740_v57  ;;  %v1431_v59 = vpop.f32.mrb[6].mxu1  ;;  %1448 = vmatprep.mubr.bf16.mxu0 %v763_v54 }
 0x267   : > { %v752_v60 = vadd.f32 %v1431_v59, %v1273_v40  ;;  %v743_v61 = vpop.f32.mrb[7].mxu1  ;;  %1449 = vmatmul.mubr.bf16.vlgmr.msra.gmra.mrb[8].mxu0 %v764_v53  ;;  %v761_v63 = vmax.f32 %v749_v56, 0.0  ;;  %v1305_v59 = vsel %vm967_vm6, 1.0, %v1880_v21 }
 0x268   : > { %v744_v62 = vadd.f32 %v1273_v40, %v743_v61  ;;  %v759_v1 = vmax.f32 %v741_v58, 0.0 }
 0x269   : > { %v762_v0 = vmax.f32 %v752_v60, 0.0 }
 0x26a   : > { %v760_v2 = vmax.f32 %v744_v62, 0.0 }
 0x26b   : > { %v766_v3 = vpack.c.bf16 %v762_v0, %v761_v63 }
 0x26c   : > { %v765_v4 = vpack.c.bf16 %v760_v2, %v759_v1  ;;  %v1307_v1 = vsel %vm969_vm7, 1.0, %v1880_v21 }
 0x26e   : > { %1452 = vmatprep.mubr.bf16.mxu1 %v765_v4 }
 0x26f   : > { %1453 = vmatmul.mubr.bf16.vlgmr.msra.gmra.mrb[8].mxu1 %v766_v3 }
 0x33a   : > { %v1450_v18 = vpop.f32.mrb[8].mxu0 }
 0x33b   : > { %v872_v20 = vpop.f32.mrb[9].mxu0  ;;  %v881_v25 = vadd.f32 %v1450_v18, %v1282_v17 }
 0x33c   : > { %v873_v26 = vadd.f32 %v1282_v17, %v872_v20  ;;  %v1451_v27 = vpop.f32.mrb[10].mxu0 }
 0x33d   : > { %v884_v30 = vadd.f32 %v1451_v27, %v1282_v17  ;;  %v875_v31 = vpop.f32.mrb[11].mxu0  ;;  %v988_v39 = vmul.f32 %v1302_v29, %v881_v25 }
 0x33e   : > { %v986_v33 = vmul.f32 %v1300_v22, %v873_v26  ;;  %v876_v35 = vadd.f32 %v1282_v17, %v875_v31 }
 0x33f   : > { %v1333_v37 = vpack.c.bf16 %v884_v30, %v881_v25  ;;  %v989_v42 = vmul.f32 %v1303_v34, %v884_v30  ;;  %v1010_v50 = vmul.f32 %v988_v39, %v988_v39 }
 0x340   : > { %v1328_v40 = vpack.c.bf16 %v876_v35, %v873_v26  ;;  %v987_v41 = vmul.f32 %v1301_v32, %v876_v35  ;;  %v1008_v43 = vmul.f32 %v986_v33, %v986_v33 }
 0x341   : > { %1345 = vst [vmem:[%s2183_s20 + $0x8] sm:$0xff] %v1333_v37   ;;  %v1011_v55 = vmul.f32 %v989_v42, %v989_v42 }
 0x342   : > { %1329 = vst [vmem:[%s2183_s20] sm:$0xff] %v1328_v40   ;;  %v994_v44 = vadd.f32 %v987_v41, %v986_v33  ;;  %v1009_v45 = vmul.f32 %v987_v41, %v987_v41  ;;  %v1454_v46 = vpop.f32.mrb[8].mxu1 }
 0x343   : > { %v888_v48 = vpop.f32.mrb[9].mxu1  ;;  %v897_v56 = vadd.f32 %v1454_v46, %v1282_v17 }
 0x344   : > { %v995_v51 = vadd.f32 %v994_v44, %v988_v39  ;;  %v1016_v52 = vadd.f32 %v1009_v45, %v1008_v43  ;;  %v889_v53 = vadd.f32 %v1282_v17, %v888_v48  ;;  %v1455_v54 = vpop.f32.mrb[10].mxu1 }
 0x345   : > { %v900_v57 = vadd.f32 %v1455_v54, %v1282_v17  ;;  %v891_v58 = vpop.f32.mrb[11].mxu1  ;;  %v992_v6 = vmul.f32 %v1306_v47, %v897_v56 }
 0x346   : > { %v1017_v60 = vadd.f32 %v1016_v52, %v1010_v50  ;;  %v990_v61 = vmul.f32 %v1304_v49, %v889_v53  ;;  %v996_v62 = vadd.f32 %v995_v51, %v989_v42  ;;  %v892_v63 = vadd.f32 %v1282_v17, %v891_v58 }
 0x347   : > { %v1343_v0 = vpack.c.bf16 %v900_v57, %v897_v56  ;;  %v993_v9 = vmul.f32 %v1307_v1, %v900_v57 }
 0x348   : > { %v997_v2 = vadd.f32 %v996_v62, %v990_v61  ;;  %v1012_v3 = vmul.f32 %v990_v61, %v990_v61  ;;  %v1018_v4 = vadd.f32 %v1017_v60, %v1011_v55  ;;  %v1338_v5 = vpack.c.bf16 %v892_v63, %v889_v53 }
 0x349   : > { %1347 = vst [vmem:[%s2183_s20 + $0x18] sm:$0xff] %v1343_v0   ;;  %v991_v7 = vmul.f32 %v1305_v59, %v892_v63 }
 0x34a   : > { %v1019_v8 = vadd.f32 %v1018_v4, %v1012_v3  ;;  %1346 = vst [vmem:[%s2183_s20 + $0x10] sm:$0xff] %v1338_v5  }
 0x34b   : > { %v998_v10 = vadd.f32 %v997_v2, %v991_v7  ;;  %v1013_v11 = vmul.f32 %v991_v7, %v991_v7 }
 0x34c   : > { %1735 = shalt.err (!%p1732_p8)
}
 0x34d   : > { %s1736_s24 = scalar_lea.hbm %s2196_s21, 512  ;;  %s1740_s20 = scalar_lea.hbm %s2323_s6, 1024 }
 0x34e   : > { %p1737_p12 = scmp.ne.s32.totalorder %s2196_s21, %s1736_s24  ;;  %p1741_p13 = scmp.lt.u32.totalorder %s2196_s21, %s2323_s6 }
 0x34f   : > { %p1742_p6 = scmp.lt.u32.totalorder %s1740_s20, %s1736_s24  ;;  %p1744_p5 = scmp.lt.u32.totalorder %s1736_s24, %s2196_s21 }
 0x350   : > { %p1738_p1 = pnand %p1737_p12, %p2089_p10 }
 0x351   : > { %p1743_p3 = por %p1742_p6, %p1741_p13 }
 0x352   : > { %p1739_p11 = pneg %p1738_p1 }
 0x353   : > { %p1745_p7 = por %p1744_p5, %p1743_p3 }
 0x355   : > { %p1746_p9 = pnand %p1745_p7, %p1739_p11 }
 0x357   : > { %1749 = shalt.err (!%p1746_p9)
}
 0x358   : > { %s1882_s26 = smov 64   ;;  %s1883_s17 = smov 4   ;;  %v1014_v12 = vmul.f32 %v992_v6, %v992_v6  ;;  %v999_v13 = vadd.f32 %v998_v10, %v992_v6  ;;  %v1020_v14 = vadd.f32 %v1019_v8, %v1013_v11  ;;  %v1015_v15 = vmul.f32 %v993_v9, %v993_v9 }
 0x359   : > { %1486 = dma.vmem_to_hbm [thread:$0]  (%p2089_p10), %s2190_s12, 512, %s2196_s21, %s1031_s19, %s1882_s26, %s1882_s26, %s1883_s17  }
 0x35a   : > { %v1000_v16 = vadd.f32 %v999_v13, %v993_v9  ;;  %v1021_v17 = vadd.f32 %v1020_v14, %v1014_v12  ;;  %s1035_s7 = sand.u32 1, %s1962_s11   ;;  %s1311_s12 = sshll.u32 %s1864_s30, 4 }
 0x35b   : > { %s392_s21 = scalar_lea.vmem [#allocation12], %s2150_s14  ;;  %s2334_s13 = scalar_lea.vmem [#allocation14], %s2150_s14 }
 0x35c   : > { %v1001_v18 = vrot.slane %v1000_v16, 4  ;;  %v1022_v19 = vadd.f32 %v1021_v17, %v1015_v15  ;;  %s1068_s19 = sshll.u32 %s392_s21, 4  ;;  %s1081_s15 = sshll.u32 %s2334_s13, 4  ;;  %s2235_s19 = int_to_ptr.vmem [resolvable:$true] %s1068_s19  ;;  %s2242_s15 = int_to_ptr.vmem [resolvable:$true] %s1081_s15 }
 0x35d   : > { %s2355_s23 = sld [smem:[#allocation23_spill]]  ;;  %s2356_s27 = sld [smem:[#allocation24_spill]] }
 0x35e   : > { %v1002_v20 = vadd.f32 %v1001_v18, %v1000_v16  ;;  %v1023_v21 = vrot.slane %v1022_v19, 4  ;;  %s2244_s17 = scalar_lea.sflag [#allocation13], %s1035_s7  ;;  %s1750_s24 = scalar_lea.vmem %s2235_s19, 16 }
 0x35f   : > { %p1751_p0 = scmp.ne.s32.totalorder %s2235_s19, %s1750_s24  ;;  %s1884_s25 = smov [#allocation12]  }
 0x360   : > { %v1003_v22 = vrot.slane %v1002_v20, 2  ;;  %v1024_v23 = vadd.f32 %v1023_v21, %v1022_v19  ;;  %s1754_s13 = sshll.u32 %s1884_s25, 4  ;;  %s1755_s13 = int_to_ptr.vmem [resolvable:$false] %s1754_s13 }
 0x361   : > { %p1752_p2 = pnand %p1751_p0, %p2089_p10  ;;  %s1756_s0 = scalar_lea.vmem %s1755_s13, 32 }
 0x362   : > { %v1025_v24 = vrot.slane %v1024_v23, 2  ;;  %v1004_v25 = vadd.f32 %v1003_v22, %v1002_v20  ;;  %p1757_p8 = scmp.lt.s32.totalorder %s2235_s19, %s1755_s13  ;;  %p1758_p12 = scmp.lt.s32.totalorder %s1756_s0, %s1750_s24 }
 0x363   : > { %s2233_s20 = scalar_lea.hbm %s2355_s23, %s1311_s12  ;;  %s2357_s22 = smov %s2356_s27 }
 0x364   : > { %v1026_v26 = vadd.f32 %v1025_v24, %v1024_v23  ;;  %v1005_v27 = vrot.slane %v1004_v25, 1  ;;  %s2240_s26 = scalar_lea.hbm %s2356_s27, %s1311_s12  ;;  %p1753_p4 = pneg %p1752_p2 }
 0x365   : > { %p1759_p1 = por %p1758_p12, %p1757_p8 }
 0x366   : > { %v1006_v28 = vadd.f32 %v1005_v27, %v1004_v25  ;;  %v1027_v29 = vrot.slane %v1026_v26, 1 }
 0x367   : > { %p1760_p11 = pnand %p1759_p1, %p1753_p4 }
 0x368   : > { %1007 = vst [vmem:[%s392_s21] sm:$0x1] %v1006_v28  ;;  %v1028_v30 = vadd.f32 %v1027_v29, %v1026_v26 }
 0x369   : > { %1763 = shalt.err (!%p1760_p11)
}
 0x36a   : > { %s1764_s7 = scalar_lea.hbm %s2233_s20, 16  ;;  %s1768_s30 = scalar_lea.hbm %s2355_s23, 32 }
 0x36b   : > { %p1765_p13 = scmp.ne.s32.totalorder %s2233_s20, %s1764_s7  ;;  %p1769_p5 = scmp.lt.u32.totalorder %s2233_s20, %s2355_s23 }
 0x36c   : > { %p1770_p7 = scmp.lt.u32.totalorder %s1768_s30, %s1764_s7  ;;  %p1772_p0 = scmp.lt.u32.totalorder %s1764_s7, %s2233_s20 }
 0x36d   : > { %p1766_p6 = pnand %p1765_p13, %p2089_p10 }
 0x36e   : > { %p1771_p9 = por %p1770_p7, %p1769_p5 }
 0x36f   : > { %p1767_p3 = pneg %p1766_p6 }
 0x370   : > { %p1773_p2 = por %p1772_p0, %p1771_p9 }
 0x372   : > { %p1774_p4 = pnand %p1773_p2, %p1767_p3 }
 0x374   : > { %1777 = shalt.err (!%p1774_p4)
}
 0x375   : > { %1487 = dma.vmem_to_hbm [thread:$0]  (%p2089_p10), %s2235_s19, 16, %s2233_s20, %s2244_s17  }
 0x376   : > { %s2358_s0 = scalar_lea.vmem [#allocation14], %s2150_s14  ;;  %s1778_s27 = scalar_lea.vmem %s2242_s15, 16 }
 0x377   : > { %1029 = vst [vmem:[%s2358_s0] sm:$0x1] %v1028_v30  ;;  %p1779_p8 = scmp.ne.s32.totalorder %s2242_s15, %s1778_s27  ;;  %s1885_s24 = smov [#allocation14]  }
 0x378   : > { %s1782_s25 = sshll.u32 %s1885_s24, 4  ;;  %s1783_s25 = int_to_ptr.vmem [resolvable:$false] %s1782_s25 }
 0x379   : > { %p1780_p12 = pnand %p1779_p8, %p2089_p10  ;;  %s1784_s7 = scalar_lea.vmem %s1783_s25, 32 }
 0x37a   : > { %p1785_p11 = scmp.lt.s32.totalorder %s2242_s15, %s1783_s25  ;;  %p1786_p13 = scmp.lt.s32.totalorder %s1784_s7, %s1778_s27 }
 0x37b   : > { %p1781_p1 = pneg %p1780_p12 }
 0x37c   : > { %p1787_p6 = por %p1786_p13, %p1785_p11 }
 0x37e   : > { %p1788_p3 = pnand %p1787_p6, %p1781_p1 }
 0x380   : > { %1791 = shalt.err (!%p1788_p3)
}
 0x381   : > { %s1792_s14 = scalar_lea.hbm %s2240_s26, 16  ;;  %s1796_s12 = scalar_lea.hbm %s2357_s22, 32 }
 0x382   : > { %p1793_p5 = scmp.ne.s32.totalorder %s2240_s26, %s1792_s14  ;;  %p1797_p0 = scmp.lt.u32.totalorder %s2240_s26, %s2357_s22 }
 0x383   : > { %p1798_p2 = scmp.lt.u32.totalorder %s1796_s12, %s1792_s14  ;;  %p1800_p8 = scmp.lt.u32.totalorder %s1792_s14, %s2240_s26 }
 0x384   : > { %p1794_p7 = pnand %p1793_p5, %p2089_p10 }
 0x385   : > { %p1799_p4 = por %p1798_p2, %p1797_p0 }
 0x386   : > { %p1795_p9 = pneg %p1794_p7 }
 0x387   : > { %p1801_p12 = por %p1800_p8, %p1799_p4 }
 0x389   : > { %p1802_p1 = pnand %p1801_p12, %p1795_p9 }
 0x38b   : > { %1805 = shalt.err (!%p1802_p1)
}
 0x38c   : > { %1488 = dma.vmem_to_hbm [thread:$0]  (%p2089_p10), %s2242_s15, 16, %s2240_s26, %s2244_s17  }
 0x38d PF: > { %s2359_s11 = sld [smem:[#allocation20_spill]]  ;;  %s2360_s13 = sld [smem:[#allocation21_spill]] }
 0x38e   : > { %p2362_p13 = scmp.ge.s32.totalorder %s1872_s10, 2 }
 0x393   : > { %s1093_s0 = sand.u32 1, %s2359_s11   ;;  %p2361_p11 = scmp.ne.s32.totalorder %s2360_s13, 0 }
 0x394   : > { %s1094_s27 = scalar_lea.sflag [#allocation5], %s1093_s0 }
 0x395   : > { %p1507_p6 = pnand %p2362_p13, %p2361_p11 }
 0x397   : > { %1843 = dma.done.wait (!%p1507_p6), %s1094_s27, 512  }
 0x398   : > { %1845 = vsyncadd (!%p1507_p6), %s1094_s27, 4294966784  ;;  %s2363_s24 = sadd.s32 4294967294, %s1872_s10  }
 0x399   : > { %s1102_s25 = sand.u32 1, %s2363_s24  }
 0x39a   : > { %s1103_s7 = scalar_lea.sflag [#allocation13], %s1102_s25 }
 0x39b   : > { %1847 = dma.done.wait (!%p1507_p6), %s1103_s7, 32  }
 0x39c   : > { %1849 = vsyncadd (!%p1507_p6), %s1103_s7, 4294967264  ;;  %s30_s10 = sadd.s32 1, %s1872_s10   ;;  %s2364_s27 = smov %s1856_s28 }
 0x39d   : > { %p27_p10 = scmp.ge.s32.totalorder %s30_s10, 4   ;;  %s2365_s28 = smov %s1860_s29 }
 0x39e   : > { %s2366_s29 = smov %s2101_s16  ;;  %s2367_s30 = smov %s1868_s9 }
 0x39f   : > { %s2368_s9 = smov %s2370_s18  ;;  %29 = sbr.rel (!%p27_p10) target bundleno = 14 (0xe), region = 142 }
 0x3a6   :  { %1115 = vsyncpa [#allocation4], 1 }
 0x3a7   :  { %1117 = vsyncpa [#allocation4 + $0x1], 1 }
 0x3a8   :  { %1118 = vsyncpa [#allocation7], 1 }
 0x3a9   :  { %1119 = vsyncpa [#allocation10], 1 }
 0x3aa   :  { %1120 = vsyncpa [#allocation5], 1 }
 0x3ab   :  { %1122 = vsyncpa [#allocation5 + $0x1], 1 }
 0x3ac   :  { %1123 = vsyncpa [#allocation13], 1 }
 0x3ad   :  { %1125 = vsyncpa [#allocation13 + $0x1], 1 }

</bundles_post_ra>
